<compile_context>
chip_gen: v7x
topology: tpu7x:2x2x1
jax: 0.10.0
libtpu: 0.0.40
codegen_flags: <defaults>
</compile_context>

<pallas_src>
import functools

import jax
import jax.numpy as jnp
from jax.experimental import pallas as pl
from jax.experimental.pallas import tpu as pltpu

HIDDEN = 120
LANE = 128
SUBLANE = 8
LEAKY_SLOPE = 0.01          # nn.LeakyReLU default negative_slope
TILE_B_MAX = 512            # safe for v5e / v6e / v7x VMEM limits


def _round_up(x, m):
    return ((x + m - 1) // m) * m


def _leaky_relu(h):
    return jnp.where(h > 0, h, LEAKY_SLOPE * h)


def force_network_kernel(x_ref,
                         w1_ref, b1_ref,
                         w2_ref, b2_ref,
                         w3_ref, b3_ref,
                         w4_ref, b4_ref,
                         w5_ref, b5_ref,
                         o_ref):
    """Fused 5-layer MLP + LeakyReLU on one (TILE_B, 128) batch tile."""

    def linear(h_bf16, w_ref, b_ref):
        # bf16 x bf16 on the MXU, f32 accumulation, f32 bias add.
        acc = jnp.dot(h_bf16, w_ref[...], preferred_element_type=jnp.float32)
        return acc + b_ref[...]

    h = x_ref[...]                                     # (TILE_B, 128) bf16
    h = _leaky_relu(linear(h, w1_ref, b1_ref)).astype(jnp.bfloat16)
    h = _leaky_relu(linear(h, w2_ref, b2_ref)).astype(jnp.bfloat16)
    h = _leaky_relu(linear(h, w3_ref, b3_ref)).astype(jnp.bfloat16)
    h = _leaky_relu(linear(h, w4_ref, b4_ref)).astype(jnp.bfloat16)
    h = linear(h, w5_ref, b5_ref)                      # final layer: no activation
    o_ref[...] = h.astype(o_ref.dtype)                 # full-lane (128-wide) store


def pad_params(params, in_channels, out_channels):
    """Zero-pad all feature dims to 128 lanes; weights -> bf16, biases -> f32 (1, 128)."""
    in_pad = _round_up(in_channels, LANE)
    hid_pad = _round_up(HIDDEN, LANE)
    out_pad = _round_up(out_channels, LANE)
    dims = [(in_pad, hid_pad), (hid_pad, hid_pad), (hid_pad, hid_pad),
            (hid_pad, hid_pad), (hid_pad, out_pad)]
    padded = {}
    for i, (din, dout) in enumerate(dims, start=1):
        w = params[f"w{i}"]
        b = params[f"b{i}"]
        wp = jnp.zeros((din, dout), jnp.bfloat16).at[:w.shape[0], :w.shape[1]].set(
            w.astype(jnp.bfloat16))
        bp = jnp.zeros((1, dout), jnp.float32).at[:, :b.shape[1]].set(b)
        padded[f"w{i}"] = wp
        padded[f"b{i}"] = bp
    return padded


@functools.partial(jax.jit, static_argnames=("in_channels", "out_channels"))
def force_network_forward(x, padded_params, *, in_channels, out_channels):
    """x: (batch, in_channels) f32.  padded_params: output of pad_params()."""
    batch = x.shape[0]
    in_pad = padded_params["w1"].shape[0]
    out_pad = padded_params["w5"].shape[1]
    hid_pad = padded_params["w1"].shape[1]

    # Batch tiling: tile must be a multiple of 8 sublanes; batch padded to a
    # whole number of tiles (zero rows are computed and discarded).
    tile_b = min(TILE_B_MAX, _round_up(batch, SUBLANE))
    padded_batch = _round_up(batch, tile_b)
    grid = (padded_batch // tile_b,)

    x_p = jnp.zeros((padded_batch, in_pad), jnp.bfloat16)
    x_p = x_p.at[:batch, :in_channels].set(x.astype(jnp.bfloat16))

    # x / out march along the batch grid; weights & biases are grid-invariant
    # (constant index_map) so they stay resident in VMEM.
    x_spec = pl.BlockSpec((tile_b, in_pad), lambda i: (i, 0))
    out_spec = pl.BlockSpec((tile_b, out_pad), lambda i: (i, 0))

    def w_spec(din, dout):
        return pl.BlockSpec((din, dout), lambda i: (0, 0))

    def b_spec(dout):
        return pl.BlockSpec((1, dout), lambda i: (0, 0))

    in_specs = [
        x_spec,
        w_spec(in_pad, hid_pad), b_spec(hid_pad),
        w_spec(hid_pad, hid_pad), b_spec(hid_pad),
        w_spec(hid_pad, hid_pad), b_spec(hid_pad),
        w_spec(hid_pad, hid_pad), b_spec(hid_pad),
        w_spec(hid_pad, out_pad), b_spec(out_pad),
    ]

    out_padded = pl.pallas_call(
        force_network_kernel,
        out_shape=jax.ShapeDtypeStruct((padded_batch, out_pad), jnp.float32),
        grid=grid,
        in_specs=in_specs,
        out_specs=out_spec,
        compiler_params=pltpu.CompilerParams(
            dimension_semantics=("parallel",)),
    )(x_p,
      padded_params["w1"], padded_params["b1"],
      padded_params["w2"], padded_params["b2"],
      padded_params["w3"], padded_params["b3"],
      padded_params["w4"], padded_params["b4"],
      padded_params["w5"], padded_params["b5"])

    # Lane-dense kernel output slab -> logical (batch, out_channels) view.
    return out_padded[:batch, :out_channels]


def init_force_network_params(key, in_channels, out_channels):
    """PyTorch nn.Linear default init: U(-1/sqrt(fan_in), 1/sqrt(fan_in)).
    Weights stored transposed to (in, out) for the kernel."""
    dims = [(in_channels, HIDDEN),
            (HIDDEN, HIDDEN),
            (HIDDEN, HIDDEN),
            (HIDDEN, HIDDEN),
            (HIDDEN, out_channels)]
    params = {}
    for i, (fan_in, fan_out) in enumerate(dims, start=1):
        key, kw, kb = jax.random.split(key, 3)
        bound = 1.0 / jnp.sqrt(fan_in)
        params[f"w{i}"] = jax.random.uniform(
            kw, (fan_in, fan_out), jnp.float32, -bound, bound)
        params[f"b{i}"] = jax.random.uniform(
            kb, (1, fan_out), jnp.float32, -bound, bound)
    return params


def force_network_reference(x, params):
    """Pure-JAX reference emulating the kernel's numerics (bf16 operands,
    f32 accumulation) on the original unpadded parameters."""
    h = x.astype(jnp.bfloat16)
    for i in range(1, 5):
        w = params[f"w{i}"].astype(jnp.bfloat16)
        h = jnp.dot(h, w, preferred_element_type=jnp.float32) + params[f"b{i}"]
        h = jnp.where(h > 0, h, LEAKY_SLOPE * h).astype(jnp.bfloat16)
    w5 = params["w5"].astype(jnp.bfloat16)
    return jnp.dot(h, w5, preferred_element_type=jnp.float32) + params["b5"]


if __name__ == "__main__":
    in_channels = 16
    out_channels = 4
    batch = 8

    key = jax.random.PRNGKey(0)
    key, kx = jax.random.split(key)
    x = jax.random.normal(kx, (batch, in_channels), jnp.float32)
    params = init_force_network_params(key, in_channels, out_channels)
    padded_params = pad_params(params, in_channels, out_channels)

    out = force_network_forward(x, padded_params,
                                in_channels=in_channels,
                                out_channels=out_channels)
    out = jax.block_until_ready(out)

    ref = force_network_reference(x, params)
    assert out.shape == (batch, out_channels), out.shape
    assert jnp.allclose(out, ref, atol=2e-2, rtol=2e-2), \
        float(jnp.max(jnp.abs(out - ref)))

    # Also sanity-check against the full-f32 reference (looser: bf16 MXU error).
    h = x
    for i in range(1, 5):
        h = h @ params[f"w{i}"] + params[f"b{i}"]
        h = jnp.where(h > 0, h, LEAKY_SLOPE * h)
    ref_f32 = h @ params["w5"] + params["b5"]
    assert jnp.allclose(out, ref_f32, atol=5e-2, rtol=5e-2), \
        float(jnp.max(jnp.abs(out - ref_f32)))

    print("KERNEL_OK")
</pallas_src>

<mosaic_0001>
module attributes {stable_mosaic.version = 11 : i64} {
  func.func @force_network_kernel(%arg0: i32, %arg1: memref<8x128xbf16, #tpu.memory_space<vmem>>, %arg2: memref<128x128xbf16, #tpu.memory_space<vmem>>, %arg3: memref<1x128xf32, #tpu.memory_space<vmem>>, %arg4: memref<128x128xbf16, #tpu.memory_space<vmem>>, %arg5: memref<1x128xf32, #tpu.memory_space<vmem>>, %arg6: memref<128x128xbf16, #tpu.memory_space<vmem>>, %arg7: memref<1x128xf32, #tpu.memory_space<vmem>>, %arg8: memref<128x128xbf16, #tpu.memory_space<vmem>>, %arg9: memref<1x128xf32, #tpu.memory_space<vmem>>, %arg10: memref<128x128xbf16, #tpu.memory_space<vmem>>, %arg11: memref<1x128xf32, #tpu.memory_space<vmem>>, %arg12: memref<8x128xf32, #tpu.memory_space<vmem>>) attributes {dimension_semantics = [#tpu.dimension_semantics<parallel>], iteration_bounds = array<i64: 1>, scalar_prefetch = 0 : i64, scratch_operands = 0 : i64, tpu.core_type = #tpu.core_type<tc>, window_params = [{transform_indices = @transform_0, window_bounds = array<i64: 8, 128>}, {pipeline_mode = #tpu.pipeline_mode<synchronous>, transform_indices = @transform_1, window_bounds = array<i64: 128, 128>}, {pipeline_mode = #tpu.pipeline_mode<synchronous>, transform_indices = @transform_2, window_bounds = array<i64: 1, 128>}, {pipeline_mode = #tpu.pipeline_mode<synchronous>, transform_indices = @transform_3, window_bounds = array<i64: 128, 128>}, {pipeline_mode = #tpu.pipeline_mode<synchronous>, transform_indices = @transform_4, window_bounds = array<i64: 1, 128>}, {pipeline_mode = #tpu.pipeline_mode<synchronous>, transform_indices = @transform_5, window_bounds = array<i64: 128, 128>}, {pipeline_mode = #tpu.pipeline_mode<synchronous>, transform_indices = @transform_6, window_bounds = array<i64: 1, 128>}, {pipeline_mode = #tpu.pipeline_mode<synchronous>, transform_indices = @transform_7, window_bounds = array<i64: 128, 128>}, {pipeline_mode = #tpu.pipeline_mode<synchronous>, transform_indices = @transform_8, window_bounds = array<i64: 1, 128>}, {pipeline_mode = #tpu.pipeline_mode<synchronous>, transform_indices = @transform_9, window_bounds = array<i64: 128, 128>}, {pipeline_mode = #tpu.pipeline_mode<synchronous>, transform_indices = @transform_10, window_bounds = array<i64: 1, 128>}, {transform_indices = @transform_11, window_bounds = array<i64: 8, 128>}]} {
    %c0 = arith.constant 0 : index
    %c0_0 = arith.constant 0 : index
    %0 = vector.load %arg1[%c0, %c0_0] : memref<8x128xbf16, #tpu.memory_space<vmem>>, vector<8x128xbf16>
    %c0_1 = arith.constant 0 : index
    %c0_2 = arith.constant 0 : index
    %1 = vector.load %arg2[%c0_1, %c0_2] : memref<128x128xbf16, #tpu.memory_space<vmem>>, vector<128x128xbf16>
    %cst = arith.constant dense<0.000000e+00> : vector<8x128xf32>
    %2 = tpu.matmul %0, %1, %cst {dimension_numbers = #tpu.dot_dimension_numbers<[1], [0], [0], [1], [0, 0, 1, 1], [], []>} : vector<8x128xbf16>, vector<128x128xbf16>, vector<8x128xf32> -> vector<8x128xf32>
    %c0_3 = arith.constant 0 : index
    %c0_4 = arith.constant 0 : index
    %3 = vector.load %arg3[%c0_3, %c0_4] : memref<1x128xf32, #tpu.memory_space<vmem>>, vector<1x128xf32>
    %4 = vector.broadcast %3 : vector<1x128xf32> to vector<8x128xf32>
    %5 = arith.addf %2, %4 : vector<8x128xf32>
    %cst_5 = arith.constant 0.000000e+00 : f32
    %6 = vector.broadcast %cst_5 : f32 to vector<8x128xf32>
    %7 = arith.cmpf ogt, %5, %6 : vector<8x128xf32>
    %cst_6 = arith.constant 0.00999999977 : f32
    %8 = vector.broadcast %cst_6 : f32 to vector<8x128xf32>
    %9 = arith.mulf %8, %5 : vector<8x128xf32>
    %10 = arith.select %7, %5, %9 : vector<8x128xi1>, vector<8x128xf32>
    %11 = arith.truncf %10 : vector<8x128xf32> to vector<8x128xbf16>
    %c0_7 = arith.constant 0 : index
    %c0_8 = arith.constant 0 : index
    %12 = vector.load %arg4[%c0_7, %c0_8] : memref<128x128xbf16, #tpu.memory_space<vmem>>, vector<128x128xbf16>
    %cst_9 = arith.constant dense<0.000000e+00> : vector<8x128xf32>
    %13 = tpu.matmul %11, %12, %cst_9 {dimension_numbers = #tpu.dot_dimension_numbers<[1], [0], [0], [1], [0, 0, 1, 1], [], []>} : vector<8x128xbf16>, vector<128x128xbf16>, vector<8x128xf32> -> vector<8x128xf32>
    %c0_10 = arith.constant 0 : index
    %c0_11 = arith.constant 0 : index
    %14 = vector.load %arg5[%c0_10, %c0_11] : memref<1x128xf32, #tpu.memory_space<vmem>>, vector<1x128xf32>
    %15 = vector.broadcast %14 : vector<1x128xf32> to vector<8x128xf32>
    %16 = arith.addf %13, %15 : vector<8x128xf32>
    %cst_12 = arith.constant 0.000000e+00 : f32
    %17 = vector.broadcast %cst_12 : f32 to vector<8x128xf32>
    %18 = arith.cmpf ogt, %16, %17 : vector<8x128xf32>
    %cst_13 = arith.constant 0.00999999977 : f32
    %19 = vector.broadcast %cst_13 : f32 to vector<8x128xf32>
    %20 = arith.mulf %19, %16 : vector<8x128xf32>
    %21 = arith.select %18, %16, %20 : vector<8x128xi1>, vector<8x128xf32>
    %22 = arith.truncf %21 : vector<8x128xf32> to vector<8x128xbf16>
    %c0_14 = arith.constant 0 : index
    %c0_15 = arith.constant 0 : index
    %23 = vector.load %arg6[%c0_14, %c0_15] : memref<128x128xbf16, #tpu.memory_space<vmem>>, vector<128x128xbf16>
    %cst_16 = arith.constant dense<0.000000e+00> : vector<8x128xf32>
    %24 = tpu.matmul %22, %23, %cst_16 {dimension_numbers = #tpu.dot_dimension_numbers<[1], [0], [0], [1], [0, 0, 1, 1], [], []>} : vector<8x128xbf16>, vector<128x128xbf16>, vector<8x128xf32> -> vector<8x128xf32>
    %c0_17 = arith.constant 0 : index
    %c0_18 = arith.constant 0 : index
    %25 = vector.load %arg7[%c0_17, %c0_18] : memref<1x128xf32, #tpu.memory_space<vmem>>, vector<1x128xf32>
    %26 = vector.broadcast %25 : vector<1x128xf32> to vector<8x128xf32>
    %27 = arith.addf %24, %26 : vector<8x128xf32>
    %cst_19 = arith.constant 0.000000e+00 : f32
    %28 = vector.broadcast %cst_19 : f32 to vector<8x128xf32>
    %29 = arith.cmpf ogt, %27, %28 : vector<8x128xf32>
    %cst_20 = arith.constant 0.00999999977 : f32
    %30 = vector.broadcast %cst_20 : f32 to vector<8x128xf32>
    %31 = arith.mulf %30, %27 : vector<8x128xf32>
    %32 = arith.select %29, %27, %31 : vector<8x128xi1>, vector<8x128xf32>
    %33 = arith.truncf %32 : vector<8x128xf32> to vector<8x128xbf16>
    %c0_21 = arith.constant 0 : index
    %c0_22 = arith.constant 0 : index
    %34 = vector.load %arg8[%c0_21, %c0_22] : memref<128x128xbf16, #tpu.memory_space<vmem>>, vector<128x128xbf16>
    %cst_23 = arith.constant dense<0.000000e+00> : vector<8x128xf32>
    %35 = tpu.matmul %33, %34, %cst_23 {dimension_numbers = #tpu.dot_dimension_numbers<[1], [0], [0], [1], [0, 0, 1, 1], [], []>} : vector<8x128xbf16>, vector<128x128xbf16>, vector<8x128xf32> -> vector<8x128xf32>
    %c0_24 = arith.constant 0 : index
    %c0_25 = arith.constant 0 : index
    %36 = vector.load %arg9[%c0_24, %c0_25] : memref<1x128xf32, #tpu.memory_space<vmem>>, vector<1x128xf32>
    %37 = vector.broadcast %36 : vector<1x128xf32> to vector<8x128xf32>
    %38 = arith.addf %35, %37 : vector<8x128xf32>
    %cst_26 = arith.constant 0.000000e+00 : f32
    %39 = vector.broadcast %cst_26 : f32 to vector<8x128xf32>
    %40 = arith.cmpf ogt, %38, %39 : vector<8x128xf32>
    %cst_27 = arith.constant 0.00999999977 : f32
    %41 = vector.broadcast %cst_27 : f32 to vector<8x128xf32>
    %42 = arith.mulf %41, %38 : vector<8x128xf32>
    %43 = arith.select %40, %38, %42 : vector<8x128xi1>, vector<8x128xf32>
    %44 = arith.truncf %43 : vector<8x128xf32> to vector<8x128xbf16>
    %c0_28 = arith.constant 0 : index
    %c0_29 = arith.constant 0 : index
    %45 = vector.load %arg10[%c0_28, %c0_29] : memref<128x128xbf16, #tpu.memory_space<vmem>>, vector<128x128xbf16>
    %cst_30 = arith.constant dense<0.000000e+00> : vector<8x128xf32>
    %46 = tpu.matmul %44, %45, %cst_30 {dimension_numbers = #tpu.dot_dimension_numbers<[1], [0], [0], [1], [0, 0, 1, 1], [], []>} : vector<8x128xbf16>, vector<128x128xbf16>, vector<8x128xf32> -> vector<8x128xf32>
    %c0_31 = arith.constant 0 : index
    %c0_32 = arith.constant 0 : index
    %47 = vector.load %arg11[%c0_31, %c0_32] : memref<1x128xf32, #tpu.memory_space<vmem>>, vector<1x128xf32>
    %48 = vector.broadcast %47 : vector<1x128xf32> to vector<8x128xf32>
    %49 = arith.addf %46, %48 : vector<8x128xf32>
    %c0_33 = arith.constant 0 : index
    %c0_34 = arith.constant 0 : index
    %50 = vector.load %arg12[%c0_33, %c0_34] : memref<8x128xf32, #tpu.memory_space<vmem>>, vector<8x128xf32>
    tpu.vector_store %arg12[%c0_33, %c0_34], %49 {strides = array<i32>} : memref<8x128xf32, #tpu.memory_space<vmem>>, vector<8x128xf32>,
    return
  }
  func.func @transform_0(%arg0: i32) -> (i32, i32) {
    %c0_i32 = arith.constant 0 : i32
    %c0_i32_0 = arith.constant 0 : i32
    return %arg0, %c0_i32 : i32, i32
  }
  func.func @transform_1(%arg0: i32) -> (i32, i32) {
    %c0_i32 = arith.constant 0 : i32
    %c0_i32_0 = arith.constant 0 : i32
    %c0_i32_1 = arith.constant 0 : i32
    return %c0_i32, %c0_i32_0 : i32, i32
  }
  func.func @transform_2(%arg0: i32) -> (i32, i32) {
    %c0_i32 = arith.constant 0 : i32
    %c0_i32_0 = arith.constant 0 : i32
    %c0_i32_1 = arith.constant 0 : i32
    return %c0_i32, %c0_i32_0 : i32, i32
  }
  func.func @transform_3(%arg0: i32) -> (i32, i32) {
    %c0_i32 = arith.constant 0 : i32
    %c0_i32_0 = arith.constant 0 : i32
    %c0_i32_1 = arith.constant 0 : i32
    return %c0_i32, %c0_i32_0 : i32, i32
  }
  func.func @transform_4(%arg0: i32) -> (i32, i32) {
    %c0_i32 = arith.constant 0 : i32
    %c0_i32_0 = arith.constant 0 : i32
    %c0_i32_1 = arith.constant 0 : i32
    return %c0_i32, %c0_i32_0 : i32, i32
  }
  func.func @transform_5(%arg0: i32) -> (i32, i32) {
    %c0_i32 = arith.constant 0 : i32
    %c0_i32_0 = arith.constant 0 : i32
    %c0_i32_1 = arith.constant 0 : i32
    return %c0_i32, %c0_i32_0 : i32, i32
  }
  func.func @transform_6(%arg0: i32) -> (i32, i32) {
    %c0_i32 = arith.constant 0 : i32
    %c0_i32_0 = arith.constant 0 : i32
    %c0_i32_1 = arith.constant 0 : i32
    return %c0_i32, %c0_i32_0 : i32, i32
  }
  func.func @transform_7(%arg0: i32) -> (i32, i32) {
    %c0_i32 = arith.constant 0 : i32
    %c0_i32_0 = arith.constant 0 : i32
    %c0_i32_1 = arith.constant 0 : i32
    return %c0_i32, %c0_i32_0 : i32, i32
  }
  func.func @transform_8(%arg0: i32) -> (i32, i32) {
    %c0_i32 = arith.constant 0 : i32
    %c0_i32_0 = arith.constant 0 : i32
    %c0_i32_1 = arith.constant 0 : i32
    return %c0_i32, %c0_i32_0 : i32, i32
  }
  func.func @transform_9(%arg0: i32) -> (i32, i32) {
    %c0_i32 = arith.constant 0 : i32
    %c0_i32_0 = arith.constant 0 : i32
    %c0_i32_1 = arith.constant 0 : i32
    return %c0_i32, %c0_i32_0 : i32, i32
  }
  func.func @transform_10(%arg0: i32) -> (i32, i32) {
    %c0_i32 = arith.constant 0 : i32
    %c0_i32_0 = arith.constant 0 : i32
    %c0_i32_1 = arith.constant 0 : i32
    return %c0_i32, %c0_i32_0 : i32, i32
  }
  func.func @transform_11(%arg0: i32) -> (i32, i32) {
    %c0_i32 = arith.constant 0 : i32
    %c0_i32_0 = arith.constant 0 : i32
    return %arg0, %c0_i32 : i32, i32
  }
}

</mosaic_0001>

<bundles_post_ra>
// kernel: force_network_forward.1
= control target key start
LH: loop header
LB: loop body
LE: loop exit
PB: predicated region body
PF: predicated region fallthrough
CT: control target
= control target key end

     0   :  { %16 = vsyncpa [#allocation3], 0  ;;  %s1271_s0 = inlined_call_operand.vmem [shape: bf16[8,128], index: 0, kind: input, shape index: {}]   ;;  %s1272_s1 = inlined_call_operand.hbm [shape: bf16[128,128], index: 1, kind: input, shape index: {}]   ;;  %s1273_s2 = inlined_call_operand.vmem [shape: f32[1,128], index: 2, kind: input, shape index: {}]   ;;  %s1274_s3 = inlined_call_operand.hbm [shape: bf16[128,128], index: 3, kind: input, shape index: {}]   ;;  %s1275_s4 = inlined_call_operand.vmem [shape: f32[1,128], index: 4, kind: input, shape index: {}]   ;;  %s1276_s5 = inlined_call_operand.hbm [shape: bf16[128,128], index: 5, kind: input, shape index: {}]   ;;  %s1277_s6 = inlined_call_operand.vmem [shape: f32[1,128], index: 6, kind: input, shape index: {}]   ;;  %s1278_s7 = inlined_call_operand.hbm [shape: bf16[128,128], index: 7, kind: input, shape index: {}]   ;;  %s1279_s8 = inlined_call_operand.vmem [shape: f32[1,128], index: 8, kind: input, shape index: {}]   ;;  %s1280_s9 = inlined_call_operand.hbm [shape: bf16[128,128], index: 9, kind: input, shape index: {}]   ;;  %s1281_s10 = inlined_call_operand.vmem [shape: f32[1,128], index: 10, kind: input, shape index: {}]   ;;  %s1282_s11 = inlined_call_operand.vmem [shape: f32[8,128], index: 11, kind: output, shape index: {}]  }
   0x1   :  { %17 = vsyncpa [#allocation5], 0 }
   0x2   :  { %18 = vsyncpa [#allocation8], 0  ;;  %s1042_s17 = smov [#allocation4]   ;;  %s1043_s19 = smov [#allocation7]  }
   0x3   :  { %s40_s18 = sshll.u32 %s1042_s17, 4  ;;  %s68_s20 = sshll.u32 %s1043_s19, 4  ;;  %s41_s18 = int_to_ptr.vmem [resolvable:$true] %s40_s18  ;;  %s1111_s20 = int_to_ptr.vmem [resolvable:$true] %s68_s20 }
   0x4   :  { %s926_s23 = scalar_lea.hbm %s1274_s3, 1024 }
   0x5   :  { %p927_p0 = scmp.ne.s32.totalorder %s1274_s3, %s926_s23  ;;  %p930_p1 = scmp.lt.u32.totalorder %s926_s23, %s1274_s3 }
   0x7   :  { %p932_p2 = pnand %p930_p1, %p927_p0 }
   0x9   :  { %935 = shalt.err (!%p932_p2)
}
   0xa   :  { %s936_s28 = scalar_lea.vmem %s41_s18, 1024  ;;  %p941_p4 = scmp.lt.s32.totalorder %s41_s18, %s41_s18 }
   0xb   :  { %p937_p3 = scmp.ne.s32.totalorder %s41_s18, %s936_s28  ;;  %p942_p5 = scmp.lt.s32.totalorder %s936_s28, %s936_s28 }
   0xd   :  { %p943_p6 = por %p942_p5, %p941_p4 }
   0xf   :  { %p944_p7 = pnand %p943_p6, %p937_p3 }
  0x11   :  { %947 = shalt.err (!%p944_p7)
}
  0x12   :  { %s1044_s29 = smov 64   ;;  %s1045_s30 = smov 4  }
  0x13   :  { %46 = dma.hbm_to_vmem [thread:$0]  %s1274_s3, 1024, %s41_s18, [#allocation5], %s1044_s29, %s1044_s29, %s1045_s30  }
  0x14   :  { %s948_s16 = scalar_lea.hbm %s1278_s7, 1024 }
  0x15   :  { %p949_p8 = scmp.ne.s32.totalorder %s1278_s7, %s948_s16  ;;  %p952_p9 = scmp.lt.u32.totalorder %s948_s16, %s1278_s7 }
  0x17   :  { %p954_p10 = pnand %p952_p9, %p949_p8 }
  0x19   :  { %957 = shalt.err (!%p954_p10)
}
  0x1a   :  { %s958_s23 = scalar_lea.vmem %s1111_s20, 1024  ;;  %p963_p12 = scmp.lt.s32.totalorder %s1111_s20, %s1111_s20 }
  0x1b   :  { %p959_p11 = scmp.ne.s32.totalorder %s1111_s20, %s958_s23  ;;  %p964_p13 = scmp.lt.s32.totalorder %s958_s23, %s958_s23 }
  0x1d   :  { %p965_p0 = por %p964_p13, %p963_p12 }
  0x1f   :  { %p966_p1 = pnand %p965_p0, %p959_p11 }
  0x21   :  { %969 = shalt.err (!%p966_p1)
}
  0x22   :  { %74 = dma.hbm_to_vmem [thread:$0]  %s1278_s7, 1024, %s1111_s20, [#allocation8], %s1044_s29, %s1044_s29, %s1045_s30  }
  0x23   :  { %s1046_s24 = smov [#allocation2]   ;;  %s1047_s26 = smov [#allocation6]  }
  0x24   :  { %s26_s25 = sshll.u32 %s1046_s24, 4  ;;  %s54_s27 = sshll.u32 %s1047_s26, 4  ;;  %s27_s25 = int_to_ptr.vmem [resolvable:$true] %s26_s25  ;;  %s1148_s27 = int_to_ptr.vmem [resolvable:$true] %s54_s27 }
  0x25   :  { %s970_s13 = scalar_lea.hbm %s1272_s1, 1024 }
  0x26   :  { %p971_p2 = scmp.ne.s32.totalorder %s1272_s1, %s970_s13  ;;  %p974_p3 = scmp.lt.u32.totalorder %s970_s13, %s1272_s1 }
  0x28   :  { %p976_p4 = pnand %p974_p3, %p971_p2 }
  0x2a   :  { %979 = shalt.err (!%p976_p4)
}
  0x2b   :  { %s980_s7 = scalar_lea.vmem %s27_s25, 1024  ;;  %p985_p6 = scmp.lt.s32.totalorder %s27_s25, %s27_s25 }
  0x2c   :  { %p981_p5 = scmp.ne.s32.totalorder %s27_s25, %s980_s7  ;;  %p986_p7 = scmp.lt.s32.totalorder %s980_s7, %s980_s7 }
  0x2e   :  { %p987_p8 = por %p986_p7, %p985_p6 }
  0x30   :  { %p988_p9 = pnand %p987_p8, %p981_p5 }
  0x32   :  { %991 = shalt.err (!%p988_p9)
}
  0x33   :  { %32 = dma.hbm_to_vmem [thread:$0]  %s1272_s1, 1024, %s27_s25, [#allocation3], %s1044_s29, %s1044_s29, %s1045_s30  }
  0x34   :  { %s992_s23 = scalar_lea.hbm %s1276_s5, 1024 }
  0x35   :  { %p993_p10 = scmp.ne.s32.totalorder %s1276_s5, %s992_s23  ;;  %p996_p11 = scmp.lt.u32.totalorder %s992_s23, %s1276_s5 }
  0x37   :  { %p998_p12 = pnand %p996_p11, %p993_p10 }
  0x39   :  { %1001 = shalt.err (!%p998_p12)
}
  0x3a   :  { %s1002_s28 = scalar_lea.vmem %s1148_s27, 1024  ;;  %p1007_p0 = scmp.lt.s32.totalorder %s1148_s27, %s1148_s27 }
  0x3b   :  { %p1003_p13 = scmp.ne.s32.totalorder %s1148_s27, %s1002_s28  ;;  %p1008_p1 = scmp.lt.s32.totalorder %s1002_s28, %s1002_s28 }
  0x3d   :  { %p1009_p2 = por %p1008_p1, %p1007_p0 }
  0x3f   :  { %p1010_p3 = pnand %p1009_p2, %p1003_p13 }
  0x41   :  { %1013 = shalt.err (!%p1010_p3)
}
  0x42   :  { %60 = dma.hbm_to_vmem [thread:$0]  %s1276_s5, 1024, %s1148_s27, [#allocation5], %s1044_s29, %s1044_s29, %s1045_s30  }
  0x43   :  { %s1048_s12 = smov [#allocation9]   ;;  %s1014_s16 = scalar_lea.hbm %s1280_s9, 1024 }
  0x44   :  { %s82_s13 = sshll.u32 %s1048_s12, 4  ;;  %p1015_p4 = scmp.ne.s32.totalorder %s1280_s9, %s1014_s16  ;;  %s83_s13 = int_to_ptr.vmem [resolvable:$true] %s82_s13 }
  0x45   :  { %p1018_p5 = scmp.lt.u32.totalorder %s1014_s16, %s1280_s9 }
  0x47   :  { %p1020_p6 = pnand %p1018_p5, %p1015_p4 }
  0x49   :  { %1023 = shalt.err (!%p1020_p6)
}
  0x4a   :  { %s1024_s21 = scalar_lea.vmem %s83_s13, 1024  ;;  %p1029_p8 = scmp.lt.s32.totalorder %s83_s13, %s83_s13 }
  0x4b   :  { %p1025_p7 = scmp.ne.s32.totalorder %s83_s13, %s1024_s21  ;;  %p1030_p9 = scmp.lt.s32.totalorder %s1024_s21, %s1024_s21 }
  0x4d   :  { %p1031_p10 = por %p1030_p9, %p1029_p8 }
  0x4f   :  { %p1032_p11 = pnand %p1031_p10, %p1025_p7 }
  0x51   :  { %1035 = shalt.err (!%p1032_p11)
}
  0x52   :  { %88 = dma.hbm_to_vmem [thread:$0]  %s1280_s9, 1024, %s83_s13, [#allocation8], %s1044_s29, %s1044_s29, %s1045_s30  }
  0x53   :  { %1036 = dma.done.wait [#allocation3], 1024  }
  0x54   :  { %1037 = vsyncadd [#allocation3], 4294966272 }
  0x55   :  { %1038 = dma.done.wait [#allocation5], 2048  }
  0x56   :  { %1039 = vsyncadd [#allocation5], 4294965248 }
  0x57   :  { %1040 = dma.done.wait [#allocation8], 2048  }
  0x58   :  { %1041 = vsyncadd [#allocation8], 4294965248  ;;  %v1049_v0 = vmov 0.0   ;;  %vm1050_vm0 = vmmov 0   ;;  %v886_v1 = vld [vmem:[#allocation2] sm:$0xff]   ;;  %v887_v2 = vld [vmem:[#allocation2 + $0x8] sm:$0xff]  }
  0x59   :  { %777 = vmatprep.subr.bf16.mxu0 %v1049_v0  ;;  %793 = vmatprep.mubr.msk.bf16.mxu0 %vm1050_vm0, %v1049_v0  ;;  %v888_v3 = vld [vmem:[#allocation2 + $0x10] sm:$0xff]   ;;  %v894_v4 = vld [vmem:[#allocation4] sm:$0xff]   ;;  %v889_v5 = vld [vmem:[#allocation2 + $0x18] sm:$0xff]  }
  0x5a   :  { %797 = vmatprep.subr.bf16.mxu1 %v1049_v0  ;;  %813 = vmatprep.mubr.msk.bf16.mxu1 %vm1050_vm0, %v1049_v0  ;;  %v895_v6 = vld [vmem:[#allocation4 + $0x8] sm:$0xff]   ;;  %v890_v7 = vld [vmem:[#allocation2 + $0x20] sm:$0xff]   ;;  %v896_v8 = vld [vmem:[#allocation4 + $0x10] sm:$0xff]  }
  0x5b   :  { %778 = vmatpush3.bf16.msra.mxu0 %v886_v1  ;;  %798 = vmatpush3.bf16.msra.mxu1 %v894_v4  ;;  %v891_v9 = vld [vmem:[#allocation2 + $0x28] sm:$0xff]   ;;  %v897_v10 = vld [vmem:[#allocation4 + $0x18] sm:$0xff]   ;;  %v892_v11 = vld [vmem:[#allocation2 + $0x30] sm:$0xff]  }
  0x5c   :  { %779 = vmatprep.subr.bf16.mxu0 %v1049_v0  ;;  %799 = vmatprep.subr.bf16.mxu1 %v1049_v0  ;;  %v898_v12 = vld [vmem:[#allocation4 + $0x20] sm:$0xff]   ;;  %v893_v13 = vld [vmem:[#allocation2 + $0x38] sm:$0xff]   ;;  %v899_v14 = vld [vmem:[#allocation4 + $0x28] sm:$0xff]  }
  0x5d   :  { %v107_v15 = vld [vmem:[%s1271_s0] sm:$0xf]  ;;  %v900_v16 = vld [vmem:[#allocation4 + $0x30] sm:$0xff]   ;;  %v901_v17 = vld [vmem:[#allocation4 + $0x38] sm:$0xff]  }
  0x5e   :  { %v902_v18 = vld [vmem:[#allocation6] sm:$0xff]   ;;  %v903_v19 = vld [vmem:[#allocation6 + $0x8] sm:$0xff]   ;;  %v904_v20 = vld [vmem:[#allocation6 + $0x10] sm:$0xff]  }
  0x5f   :  { %780 = vmatpush3.bf16.msra.mxu0 %v887_v2  ;;  %800 = vmatpush3.bf16.msra.mxu1 %v895_v6  ;;  %v905_v21 = vld [vmem:[#allocation6 + $0x18] sm:$0xff]   ;;  %v906_v22 = vld [vmem:[#allocation6 + $0x20] sm:$0xff]   ;;  %v907_v23 = vld [vmem:[#allocation6 + $0x28] sm:$0xff]  }
  0x60   :  { %781 = vmatprep.subr.bf16.mxu0 %v1049_v0  ;;  %801 = vmatprep.subr.bf16.mxu1 %v1049_v0  ;;  %v687_v24 = vld [vmem:[%s1273_s2] ss:$0 sm:$0xff]  ;;  %v908_v33 = vld [vmem:[#allocation6 + $0x30] sm:$0xff]   ;;  %v909_v34 = vld [vmem:[#allocation6 + $0x38] sm:$0xff]  }
  0x61   :  { %v910_v35 = vld [vmem:[#allocation7] sm:$0xff]   ;;  %v911_v36 = vld [vmem:[#allocation7 + $0x8] sm:$0xff]   ;;  %v912_v37 = vld [vmem:[#allocation7 + $0x10] sm:$0xff]  }
  0x62   :  { %v913_v38 = vld [vmem:[#allocation7 + $0x18] sm:$0xff]   ;;  %v914_v39 = vld [vmem:[#allocation7 + $0x20] sm:$0xff]   ;;  %v915_v40 = vld [vmem:[#allocation7 + $0x28] sm:$0xff]  }
  0x63   :  { %782 = vmatpush3.bf16.msra.mxu0 %v888_v3  ;;  %802 = vmatpush3.bf16.msra.mxu1 %v896_v8  ;;  %v696_v41 = vld [vmem:[%s1275_s4] ss:$0 sm:$0xff]  ;;  %v916_v50 = vld [vmem:[#allocation7 + $0x30] sm:$0xff]   ;;  %v917_v51 = vld [vmem:[#allocation7 + $0x38] sm:$0xff]  }
  0x64   :  { %783 = vmatprep.subr.bf16.mxu0 %v1049_v0  ;;  %803 = vmatprep.subr.bf16.mxu1 %v1049_v0  ;;  %v918_v52 = vld [vmem:[#allocation9] sm:$0xff]   ;;  %v919_v53 = vld [vmem:[#allocation9 + $0x8] sm:$0xff]   ;;  %v920_v54 = vld [vmem:[#allocation9 + $0x10] sm:$0xff]  }
  0x65   :  { %v921_v55 = vld [vmem:[#allocation9 + $0x18] sm:$0xff]   ;;  %v922_v56 = vld [vmem:[#allocation9 + $0x20] sm:$0xff]   ;;  %v923_v57 = vld [vmem:[#allocation9 + $0x28] sm:$0xff]  }
  0x66   :  { %v705_v58 = vld [vmem:[%s1277_s6] ss:$0 sm:$0xff]  ;;  %v924_v4 = vld [vmem:[#allocation9 + $0x30] sm:$0xff]  }
  0x67   :  { %784 = vmatpush3.bf16.msra.mxu0 %v889_v5  ;;  %804 = vmatpush3.bf16.msra.mxu1 %v897_v10  ;;  %v925_v5 = vld [vmem:[#allocation9 + $0x38] sm:$0xff]   ;;  %v714_v6 = vld [vmem:[%s1279_s8] ss:$0 sm:$0xff] }
  0x68   :  { %785 = vmatprep.subr.bf16.mxu0 %v1049_v0  ;;  %805 = vmatprep.subr.bf16.mxu1 %v1049_v0 }
  0x6b   :  { %786 = vmatpush3.bf16.msra.mxu0 %v890_v7  ;;  %806 = vmatpush3.bf16.msra.mxu1 %v898_v12 }
  0x6c   :  { %787 = vmatprep.subr.bf16.mxu0 %v1049_v0  ;;  %807 = vmatprep.subr.bf16.mxu1 %v1049_v0 }
  0x6f   :  { %788 = vmatpush3.bf16.msra.mxu0 %v891_v9  ;;  %808 = vmatpush3.bf16.msra.mxu1 %v899_v14 }
  0x70   :  { %789 = vmatprep.subr.bf16.mxu0 %v1049_v0  ;;  %809 = vmatprep.subr.bf16.mxu1 %v1049_v0 }
  0x73   :  { %790 = vmatpush3.bf16.msra.mxu0 %v892_v11  ;;  %810 = vmatpush3.bf16.msra.mxu1 %v900_v16 }
  0x74   :  { %791 = vmatprep.subr.bf16.mxu0 %v1049_v0  ;;  %811 = vmatprep.subr.bf16.mxu1 %v1049_v0 }
  0x77   :  { %792 = vmatpush3.bf16.msra.mxu0 %v893_v13  ;;  %812 = vmatpush3.bf16.msra.mxu1 %v901_v17 }
  0x78   :  { %817 = vmatprep.subr.bf16.mxu0 %v1049_v0  ;;  %837 = vmatprep.subr.bf16.mxu1 %v1049_v0 }
  0x7a   :  { %794 = vmatmul.mubr.bf16.vlgmr.msra.gmra.mrb[0].mxu0 %v107_v15 }
  0x7b   :  { %833 = vmatprep.mubr.msk.bf16.mxu0 %vm1050_vm0, %v1049_v0  ;;  %818 = vmatpush3.bf16.msra.mxu0 %v902_v18 }
  0x7c   :  { %819 = vmatprep.subr.bf16.mxu0 %v1049_v0 }
  0x7f   :  { %820 = vmatpush3.bf16.msra.mxu0 %v903_v19 }
  0x80   :  { %821 = vmatprep.subr.bf16.mxu0 %v1049_v0 }
  0x83   :  { %822 = vmatpush3.bf16.msra.mxu0 %v904_v20 }
  0x84   :  { %823 = vmatprep.subr.bf16.mxu0 %v1049_v0 }
  0x87   :  { %824 = vmatpush3.bf16.msra.mxu0 %v905_v21 }
  0x88   :  { %825 = vmatprep.subr.bf16.mxu0 %v1049_v0 }
  0x8b   :  { %826 = vmatpush3.bf16.msra.mxu0 %v906_v22 }
  0x8c   :  { %827 = vmatprep.subr.bf16.mxu0 %v1049_v0 }
  0x8f   :  { %828 = vmatpush3.bf16.msra.mxu0 %v907_v23 }
  0x90   :  { %829 = vmatprep.subr.bf16.mxu0 %v1049_v0 }
  0x93   :  { %830 = vmatpush3.bf16.msra.mxu0 %v908_v33 }
  0x94   :  { %831 = vmatprep.subr.bf16.mxu0 %v1049_v0 }
  0x97   :  { %832 = vmatpush3.bf16.msra.mxu0 %v909_v34 }
  0x98   :  { %857 = vmatprep.subr.bf16.mxu0 %v1049_v0 }
 0x14d   :  { %v213_v25 = vpop.f32.mrb[0].mxu0 }
 0x14e   :  { %v214_v26 = vadd.f32 %v687_v24, %v213_v25  ;;  %v795_v27 = vpop.f32.mrb[1].mxu0 }
 0x14f   :  { %v216_v28 = vpop.f32.mrb[2].mxu0 }
 0x150   :  { %vm219_vm1 = vcmp.gt.f32.partialorder %v214_v26, 0.0  ;;  %v220_v29 = vmul.f32 0.01, %v214_v26  ;;  %v796_v30 = vpop.f32.mrb[3].mxu0 }
 0x152   :  { %v221_v31 = vsel %vm219_vm1, %v214_v26, %v220_v29 }
 0x153   :  { %v222_v32 = vpack.c.bf16 %v221_v31, %v221_v31 }
 0x155   :  { %814 = vmatmul.mubr.bf16.vlgmr.msra.gmra.mrb[0].mxu1 %v222_v32 }
 0x156   :  { %853 = vmatprep.mubr.msk.bf16.mxu1 %vm1050_vm0, %v1049_v0  ;;  %838 = vmatpush3.bf16.msra.mxu1 %v910_v35 }
 0x157   :  { %839 = vmatprep.subr.bf16.mxu1 %v1049_v0 }
 0x15a   :  { %840 = vmatpush3.bf16.msra.mxu1 %v911_v36 }
 0x15b   :  { %841 = vmatprep.subr.bf16.mxu1 %v1049_v0 }
 0x15e   :  { %842 = vmatpush3.bf16.msra.mxu1 %v912_v37 }
 0x15f   :  { %843 = vmatprep.subr.bf16.mxu1 %v1049_v0 }
 0x162   :  { %844 = vmatpush3.bf16.msra.mxu1 %v913_v38 }
 0x163   :  { %845 = vmatprep.subr.bf16.mxu1 %v1049_v0 }
 0x166   :  { %846 = vmatpush3.bf16.msra.mxu1 %v914_v39 }
 0x167   :  { %847 = vmatprep.subr.bf16.mxu1 %v1049_v0 }
 0x16a   :  { %848 = vmatpush3.bf16.msra.mxu1 %v915_v40 }
 0x16b   :  { %849 = vmatprep.subr.bf16.mxu1 %v1049_v0 }
 0x16e   :  { %850 = vmatpush3.bf16.msra.mxu1 %v916_v50 }
 0x16f   :  { %851 = vmatprep.subr.bf16.mxu1 %v1049_v0 }
 0x172   :  { %852 = vmatpush3.bf16.msra.mxu1 %v917_v51 }
 0x228   :  { %v328_v42 = vpop.f32.mrb[0].mxu1 }
 0x229   :  { %v329_v43 = vadd.f32 %v696_v41, %v328_v42  ;;  %v815_v44 = vpop.f32.mrb[1].mxu1 }
 0x22a   :  { %v331_v45 = vpop.f32.mrb[2].mxu1 }
 0x22b   :  { %vm334_vm2 = vcmp.gt.f32.partialorder %v329_v43, 0.0  ;;  %v335_v46 = vmul.f32 0.01, %v329_v43  ;;  %v816_v47 = vpop.f32.mrb[3].mxu1 }
 0x22d   :  { %v336_v48 = vsel %vm334_vm2, %v329_v43, %v335_v46 }
 0x22e   :  { %v337_v49 = vpack.c.bf16 %v336_v48, %v336_v48 }
 0x230   :  { %834 = vmatmul.mubr.bf16.vlgmr.msra.gmra.mrb[4].mxu0 %v337_v49 }
 0x231   :  { %873 = vmatprep.mubr.msk.bf16.mxu0 %vm1050_vm0, %v1049_v0  ;;  %858 = vmatpush3.bf16.msra.mxu0 %v918_v52 }
 0x232   :  { %859 = vmatprep.subr.bf16.mxu0 %v1049_v0 }
 0x235   :  { %860 = vmatpush3.bf16.msra.mxu0 %v919_v53 }
 0x236   :  { %861 = vmatprep.subr.bf16.mxu0 %v1049_v0 }
 0x239   :  { %862 = vmatpush3.bf16.msra.mxu0 %v920_v54 }
 0x23a   :  { %863 = vmatprep.subr.bf16.mxu0 %v1049_v0 }
 0x23d   :  { %864 = vmatpush3.bf16.msra.mxu0 %v921_v55 }
 0x23e   :  { %865 = vmatprep.subr.bf16.mxu0 %v1049_v0 }
 0x241   :  { %866 = vmatpush3.bf16.msra.mxu0 %v922_v56 }
 0x242   :  { %867 = vmatprep.subr.bf16.mxu0 %v1049_v0 }
 0x245   :  { %868 = vmatpush3.bf16.msra.mxu0 %v923_v57 }
 0x246   :  { %869 = vmatprep.subr.bf16.mxu0 %v1049_v0 }
 0x249   :  { %870 = vmatpush3.bf16.msra.mxu0 %v924_v4 }
 0x24a   :  { %871 = vmatprep.subr.bf16.mxu0 %v1049_v0  ;;  %v723_v0 = vld [vmem:[%s1281_s10] ss:$0 sm:$0xff] }
 0x24d   :  { %872 = vmatpush3.bf16.msra.mxu0 %v925_v5 }
 0x303   :  { %v443_v59 = vpop.f32.mrb[4].mxu0 }
 0x304   :  { %v444_v60 = vadd.f32 %v705_v58, %v443_v59  ;;  %v835_v61 = vpop.f32.mrb[5].mxu0 }
 0x305   :  { %v446_v62 = vpop.f32.mrb[6].mxu0 }
 0x306   :  { %vm449_vm3 = vcmp.gt.f32.partialorder %v444_v60, 0.0  ;;  %v450_v63 = vmul.f32 0.01, %v444_v60  ;;  %v836_v1 = vpop.f32.mrb[7].mxu0 }
 0x308   :  { %v451_v2 = vsel %vm449_vm3, %v444_v60, %v450_v63 }
 0x309   :  { %v452_v3 = vpack.c.bf16 %v451_v2, %v451_v2 }
 0x30b   :  { %854 = vmatmul.mubr.bf16.vlgmr.msra.gmra.mrb[4].mxu1 %v452_v3 }
 0x3de   :  { %v558_v7 = vpop.f32.mrb[4].mxu1 }
 0x3df   :  { %v559_v8 = vadd.f32 %v714_v6, %v558_v7  ;;  %v855_v9 = vpop.f32.mrb[5].mxu1 }
 0x3e0   :  { %v561_v10 = vpop.f32.mrb[6].mxu1 }
 0x3e1   :  { %vm564_vm4 = vcmp.gt.f32.partialorder %v559_v8, 0.0  ;;  %v565_v11 = vmul.f32 0.01, %v559_v8  ;;  %v856_v12 = vpop.f32.mrb[7].mxu1 }
 0x3e3   :  { %v566_v13 = vsel %vm564_vm4, %v559_v8, %v565_v11 }
 0x3e4   :  { %v567_v14 = vpack.c.bf16 %v566_v13, %v566_v13 }
 0x3e6   :  { %874 = vmatmul.mubr.bf16.vlgmr.msra.gmra.mrb[8].mxu0 %v567_v14 }
 0x4b9   :  { %v673_v15 = vpop.f32.mrb[8].mxu0 }
 0x4ba   :  { %v674_v16 = vadd.f32 %v723_v0, %v673_v15  ;;  %v875_v17 = vpop.f32.mrb[9].mxu0 }
 0x4bb   :  { %v676_v18 = vpop.f32.mrb[10].mxu0 }
 0x4bc   :  { %679 = vst [vmem:[%s1282_s11] sm:$0xff] %v674_v16  ;;  %v876_v19 = vpop.f32.mrb[11].mxu0 }
 0x4bd   :  { %684 = vsyncpa [#allocation3], 1 }
 0x4be   :  { %685 = vsyncpa [#allocation5], 1 }
 0x4bf   :  { %686 = vsyncpa [#allocation8], 1 }

</bundles_post_ra>
